<compile_context>
chip_gen: v5e
topology: v5e:2x2
jax: 0.10.0
libtpu: 0.0.40
codegen_flags: <defaults>
</compile_context>

<pallas_src>
import jax
import jax.numpy as jnp
from jax import lax
from jax.experimental import pallas as pl
from jax.experimental.pallas import tpu as pltpu

LARGE_NUMBER = 1000000.0
SMALL_NUMBER = -1000000.0


def _perfect_predictor_kernel(chars_ref, states_ref, trans_row_ref, preds_t_ref,
                              result_ref, new_hidden_ref):
    """One grid step == one lane-dense batch tile of TILE_B elements.

    chars_ref, states_ref : (1, TILE_B) int32        — batch on the lane axis
    trans_row_ref         : (1, S*C)    float32      — transitions flattened (exact small ints)
    preds_t_ref           : (C, S*C)    float32      — predictions[wrap(transitions)] transposed
    result_ref            : (C, TILE_B) float32
    new_hidden_ref        : (1, TILE_B) int32
    """
    tile_b = chars_ref.shape[1]
    n_chars, sc = preds_t_ref.shape
    num_states = sc // n_chars

    chars = chars_ref[...]                                           # (1, TILE_B)
    states = states_ref[...]                                         # (1, TILE_B)
    # python-style wrap of negative hidden states (e.g. the -1 sentinel fed back)
    states = jnp.where(states < 0, states + num_states, states)
    idx = states * n_chars + chars                                   # flat (state, char) index

    # Single one-hot over the combined index; batch stays on the lane axis.
    k_iota = lax.broadcasted_iota(jnp.int32, (sc, tile_b), 0)
    one_hot = (k_iota == idx).astype(jnp.float32)                    # (S*C, TILE_B)

    # Two MXU matmuls sharing the one-hot; N = TILE_B lanes (lane-dense output tiles).
    ns_f = jnp.dot(trans_row_ref[...], one_hot,
                   preferred_element_type=jnp.float32)               # (1, TILE_B)
    new_hidden_ref[...] = ns_f.astype(jnp.int32)                     # exact small ints in f32

    result_ref[...] = jnp.dot(preds_t_ref[...], one_hot,
                              preferred_element_type=jnp.float32)    # (C, TILE_B)


def _round_up(x, m):
    return (x + m - 1) // m * m


def perfect_predictor_forward(input_chars, hidden, transitions, predictions,
                              tile_b=2048):
    """input_chars: (B,) int, hidden: (B,) int,
       transitions: (num_states, n_chars) int, predictions: (num_states, n_chars) f32.
       Returns (result (B, n_chars) f32, new_hidden (B,) int32)."""
    batch = input_chars.shape[0]
    num_states, n_chars = predictions.shape
    sc = num_states * n_chars

    # --- tiny fused lookup tables (column k == flattened (state, char) pair) ---
    trans_flat = transitions.reshape(-1).astype(jnp.int32)                    # (S*C,)
    trans_row = trans_flat.astype(jnp.float32).reshape(1, sc)                 # (1, S*C)
    wrapped = jnp.where(trans_flat < 0, trans_flat + num_states, trans_flat)  # python-style wrap
    preds_t = predictions.astype(jnp.float32)[wrapped].T                      # (C, S*C)

    # --- lane-dense tiling: batch on the lane axis, tiles multiple of 256 ---
    LANE_TILE = 256
    # cap tile so the (S*C, tile_b) f32 one-hot temporary stays well under VMEM (v7x: 64 MiB)
    cap = max(LANE_TILE, ((8 << 20) // (4 * sc)) // LANE_TILE * LANE_TILE)
    tile_b = max(LANE_TILE, min(_round_up(tile_b, LANE_TILE), cap))

    padded0 = _round_up(batch, LANE_TILE)
    tile_b = min(tile_b, padded0)
    # prefer >= 2 grid steps when the batch allows it (megacore sharding on v7x)
    if padded0 // tile_b < 2 and padded0 >= 2 * LANE_TILE:
        tile_b = max(LANE_TILE, (padded0 // 2) // LANE_TILE * LANE_TILE)
    padded = _round_up(padded0, tile_b)
    pad = padded - batch

    chars = jnp.pad(input_chars.astype(jnp.int32), (0, pad)).reshape(1, padded)
    states = jnp.pad(hidden.astype(jnp.int32), (0, pad)).reshape(1, padded)

    grid = (padded // tile_b,)

    result_t, new_hidden = pl.pallas_call(
        _perfect_predictor_kernel,
        out_shape=(
            jax.ShapeDtypeStruct((n_chars, padded), jnp.float32),
            jax.ShapeDtypeStruct((1, padded), jnp.int32),
        ),
        grid=grid,
        in_specs=[
            pl.BlockSpec((1, tile_b), lambda i: (0, i)),      # chars tile (lane-dense)
            pl.BlockSpec((1, tile_b), lambda i: (0, i)),      # states tile (lane-dense)
            pl.BlockSpec((1, sc), lambda i: (0, 0)),          # transitions table (resident)
            pl.BlockSpec((n_chars, sc), lambda i: (0, 0)),    # predictions table (resident)
        ],
        out_specs=(
            pl.BlockSpec((n_chars, tile_b), lambda i: (0, i)),  # result tile (lane-dense)
            pl.BlockSpec((1, tile_b), lambda i: (0, i)),        # new_hidden tile (lane-dense)
        ),
        compiler_params=pltpu.CompilerParams(
            dimension_semantics=("parallel",)),                 # megacore split on v7x
    )(chars, states, trans_row, preds_t)

    # back to the PyTorch (batch, n_chars) layout; the transpose is a cheap contiguous XLA op
    result = result_t.T[:batch]
    return result, new_hidden[0, :batch]


if __name__ == "__main__":
    # Deterministically construct a small random-walk graph (mimics WalkGraph).
    num_states, n_chars, batch = 5, 4, 8
    key = jax.random.PRNGKey(0)
    k1, k2, k3, _ = jax.random.split(key, 4)

    transitions = jax.random.randint(k1, (num_states, n_chars), 0, num_states).astype(jnp.int32)
    invalid = jax.random.bernoulli(k2, 0.3, (num_states, n_chars))
    transitions = jnp.where(invalid, jnp.int32(-1), transitions)        # -1 == no edge
    predictions = jnp.where(transitions >= 0, LARGE_NUMBER, SMALL_NUMBER).astype(jnp.float32)

    input_chars = jax.random.randint(k3, (batch,), 0, n_chars).astype(jnp.int32)
    hidden = jnp.zeros((batch,), dtype=jnp.int32)                       # init_hidden(starting_state=0)

    result, new_hidden = perfect_predictor_forward(input_chars, hidden, transitions, predictions)
    jax.block_until_ready((result, new_hidden))

    # Pure-JAX reference check of the forward semantics.
    ns_ref = transitions[hidden, input_chars]
    row_ref = jnp.where(ns_ref < 0, ns_ref + num_states, ns_ref)
    res_ref = predictions[row_ref]
    assert jnp.array_equal(new_hidden, ns_ref), "new_hidden mismatch"
    assert jnp.array_equal(result, res_ref), "result mismatch"

    # Feed new_hidden back in (may contain the -1 sentinel) — checks python-style row wrap.
    result2, new_hidden2 = perfect_predictor_forward(input_chars, ns_ref, transitions, predictions)
    jax.block_until_ready((result2, new_hidden2))
    s_w = jnp.where(ns_ref < 0, ns_ref + num_states, ns_ref)
    ns_ref2 = transitions[s_w, input_chars]
    res_ref2 = predictions[jnp.where(ns_ref2 < 0, ns_ref2 + num_states, ns_ref2)]
    assert jnp.array_equal(new_hidden2, ns_ref2), "new_hidden mismatch (wrapped hidden)"
    assert jnp.array_equal(result2, res_ref2), "result mismatch (wrapped hidden)"

    # TODO(synk): if this forward is called once per rollout timestep, fuse T steps into a single
    # pallas_call carrying the hidden state in VMEM scratch to remove per-call dispatch overhead.
    print("KERNEL_OK")
</pallas_src>

<mosaic_0001>
module attributes {stable_mosaic.version = 11 : i64} {
  func.func @_perfect_predictor_kernel(%arg0: i32, %arg1: memref<1x256xi32, #tpu.memory_space<vmem>>, %arg2: memref<1x256xi32, #tpu.memory_space<vmem>>, %arg3: memref<1x20xf32, #tpu.memory_space<vmem>>, %arg4: memref<4x20xf32, #tpu.memory_space<vmem>>, %arg5: memref<4x256xf32, #tpu.memory_space<vmem>>, %arg6: memref<1x256xi32, #tpu.memory_space<vmem>>) attributes {dimension_semantics = [#tpu.dimension_semantics<parallel>], iteration_bounds = array<i64: 1>, scalar_prefetch = 0 : i64, scratch_operands = 0 : i64, tpu.core_type = #tpu.core_type<tc>, window_params = [{transform_indices = @transform_0, window_bounds = array<i64: 1, 256>}, {transform_indices = @transform_1, window_bounds = array<i64: 1, 256>}, {pipeline_mode = #tpu.pipeline_mode<synchronous>, transform_indices = @transform_2, window_bounds = array<i64: 1, 20>}, {pipeline_mode = #tpu.pipeline_mode<synchronous>, transform_indices = @transform_3, window_bounds = array<i64: 4, 20>}, {transform_indices = @transform_4, window_bounds = array<i64: 4, 256>}, {transform_indices = @transform_5, window_bounds = array<i64: 1, 256>}]} {
    %c0 = arith.constant 0 : index
    %c0_0 = arith.constant 0 : index
    %0 = vector.load %arg1[%c0, %c0_0] : memref<1x256xi32, #tpu.memory_space<vmem>>, vector<1x256xi32>
    %c0_1 = arith.constant 0 : index
    %c0_2 = arith.constant 0 : index
    %1 = vector.load %arg2[%c0_1, %c0_2] : memref<1x256xi32, #tpu.memory_space<vmem>>, vector<1x256xi32>
    %c0_i32 = arith.constant 0 : i32
    %2 = vector.broadcast %c0_i32 : i32 to vector<1x256xi32>
    %3 = arith.cmpi slt, %1, %2 : vector<1x256xi32>
    %c5_i32 = arith.constant 5 : i32
    %4 = vector.broadcast %c5_i32 : i32 to vector<1x256xi32>
    %5 = arith.addi %1, %4 : vector<1x256xi32>
    %6 = arith.select %3, %5, %1 : vector<1x256xi1>, vector<1x256xi32>
    %c4_i32 = arith.constant 4 : i32
    %7 = vector.broadcast %c4_i32 : i32 to vector<1x256xi32>
    %8 = arith.muli %6, %7 : vector<1x256xi32>
    %9 = arith.addi %8, %0 : vector<1x256xi32>
    %10 = tpu.iota {dimensions = array<i32: 0>} : vector<20x256xi32>
    %11 = vector.broadcast %9 : vector<1x256xi32> to vector<20x256xi32>
    %12 = arith.cmpi eq, %10, %11 : vector<20x256xi32>
    %13 = arith.extui %12 : vector<20x256xi1> to vector<20x256xi32>
    %14 = arith.sitofp %13 : vector<20x256xi32> to vector<20x256xf32>
    %c0_3 = arith.constant 0 : index
    %c0_4 = arith.constant 0 : index
    %15 = vector.load %arg3[%c0_3, %c0_4] : memref<1x20xf32, #tpu.memory_space<vmem>>, vector<1x20xf32>
    %cst = arith.constant dense<0.000000e+00> : vector<1x256xf32>
    %16 = tpu.matmul %15, %14, %cst {dimension_numbers = #tpu.dot_dimension_numbers<[1], [0], [0], [1], [0, 0, 1, 1], [], []>} : vector<1x20xf32>, vector<20x256xf32>, vector<1x256xf32> -> vector<1x256xf32>
    %17 = arith.fptosi %16 : vector<1x256xf32> to vector<1x256xi32>
    %c0_5 = arith.constant 0 : index
    %c0_6 = arith.constant 0 : index
    %18 = vector.load %arg6[%c0_5, %c0_6] : memref<1x256xi32, #tpu.memory_space<vmem>>, vector<1x256xi32>
    tpu.vector_store %arg6[%c0_5, %c0_6], %17 {strides = array<i32>} : memref<1x256xi32, #tpu.memory_space<vmem>>, vector<1x256xi32>,
    %c0_7 = arith.constant 0 : index
    %c0_8 = arith.constant 0 : index
    %19 = vector.load %arg4[%c0_7, %c0_8] : memref<4x20xf32, #tpu.memory_space<vmem>>, vector<4x20xf32>
    %cst_9 = arith.constant dense<0.000000e+00> : vector<4x256xf32>
    %20 = tpu.matmul %19, %14, %cst_9 {dimension_numbers = #tpu.dot_dimension_numbers<[1], [0], [0], [1], [0, 0, 1, 1], [], []>} : vector<4x20xf32>, vector<20x256xf32>, vector<4x256xf32> -> vector<4x256xf32>
    %c0_10 = arith.constant 0 : index
    %c0_11 = arith.constant 0 : index
    %21 = vector.load %arg5[%c0_10, %c0_11] : memref<4x256xf32, #tpu.memory_space<vmem>>, vector<4x256xf32>
    tpu.vector_store %arg5[%c0_10, %c0_11], %20 {strides = array<i32>} : memref<4x256xf32, #tpu.memory_space<vmem>>, vector<4x256xf32>,
    return
  }
  func.func @transform_0(%arg0: i32) -> (i32, i32) {
    %c0_i32 = arith.constant 0 : i32
    %c0_i32_0 = arith.constant 0 : i32
    return %c0_i32, %arg0 : i32, i32
  }
  func.func @transform_1(%arg0: i32) -> (i32, i32) {
    %c0_i32 = arith.constant 0 : i32
    %c0_i32_0 = arith.constant 0 : i32
    return %c0_i32, %arg0 : i32, i32
  }
  func.func @transform_2(%arg0: i32) -> (i32, i32) {
    %c0_i32 = arith.constant 0 : i32
    %c0_i32_0 = arith.constant 0 : i32
    %c0_i32_1 = arith.constant 0 : i32
    return %c0_i32, %c0_i32_0 : i32, i32
  }
  func.func @transform_3(%arg0: i32) -> (i32, i32) {
    %c0_i32 = arith.constant 0 : i32
    %c0_i32_0 = arith.constant 0 : i32
    %c0_i32_1 = arith.constant 0 : i32
    return %c0_i32, %c0_i32_0 : i32, i32
  }
  func.func @transform_4(%arg0: i32) -> (i32, i32) {
    %c0_i32 = arith.constant 0 : i32
    %c0_i32_0 = arith.constant 0 : i32
    return %c0_i32, %arg0 : i32, i32
  }
  func.func @transform_5(%arg0: i32) -> (i32, i32) {
    %c0_i32 = arith.constant 0 : i32
    %c0_i32_0 = arith.constant 0 : i32
    return %c0_i32, %arg0 : i32, i32
  }
}

</mosaic_0001>

<bundles_post_ra>
// kernel: tpu_custom_call.1
= control target key start
LH: loop header
LB: loop body
LE: loop exit
PB: predicated region body
PF: predicated region fallthrough
CT: control target
= control target key end

     0   :  { %11 = vsyncpa [#allocation3], 0  ;;  %s468_s0 = inlined_call_operand.hbm [shape: s32[1,256], index: 0, kind: input, shape index: {}]   ;;  %s469_s1 = inlined_call_operand.hbm [shape: s32[1,256], index: 1, kind: input, shape index: {}]   ;;  %s470_s2 = inlined_call_operand.vmem [shape: f32[1,20], index: 2, kind: input, shape index: {}]   ;;  %s471_s3 = inlined_call_operand.hbm [shape: f32[4,20], index: 3, kind: input, shape index: {}]   ;;  %s472_s4 = inlined_call_operand.hbm [shape: f32[4,256], index: 4, kind: output, shape index: {0}]   ;;  %s473_s5 = inlined_call_operand.hbm [shape: s32[1,256], index: 5, kind: output, shape index: {1}]  }
   0x1   :  { %12 = vsyncpa [#allocation6], 0 }
   0x2   :  { %13 = vsyncpa [#allocation4], 0  ;;  %s31_s20 = sshll.u32 %s469_s1, 4  ;;  %s32_s20 = int_to_ptr.hbm [resolvable:$true] %s31_s20 }
   0x3   :  { %14 = vsyncpa [#allocation10], 0  ;;  %s406_s21 = smov [#allocation5]   ;;  %s20_s25 = sshll.u32 %s468_s0, 4  ;;  %s21_s25 = int_to_ptr.hbm [resolvable:$true] %s20_s25 }
   0x4   :  { %s33_s22 = sshll.u32 %s406_s21, 4  ;;  %s407_s26 = smov [#allocation2]   ;;  %s34_s22 = int_to_ptr.vmem [resolvable:$true] %s33_s22 }
   0x5   :  { %36 = dma.hbm_to_vmem [thread:$0]  %s32_s20, 32, %s34_s22, [#allocation6]  }
   0x6   :  { %s22_s27 = sshll.u32 %s407_s26, 4  ;;  %s44_s30 = sshll.u32 %s471_s3, 4  ;;  %s23_s27 = int_to_ptr.vmem [resolvable:$true] %s22_s27  ;;  %s45_s30 = int_to_ptr.hbm [resolvable:$true] %s44_s30 }
   0x7   :  { %25 = dma.hbm_to_vmem [thread:$0]  %s21_s25, 32, %s23_s27, [#allocation3]  }
   0x8   :  { %s408_s1 = smov [#allocation7]  }
   0x9   :  { %s46_s6 = sshll.u32 %s408_s1, 4  ;;  %s47_s6 = int_to_ptr.vmem [resolvable:$true] %s46_s6 }
   0xa   :  { %49 = dma.hbm_to_vmem [thread:$0]  %s45_s30, 64, %s47_s6, [#allocation6]  }
   0xb   :  { %398 = dma.done.wait [#allocation3], 32  }
   0xc   :  { %399 = vsyncadd [#allocation3], 4294967264 }
   0xd   :  { %400 = dma.done.wait [#allocation6], 96  }
   0xe   :  { %401 = vsyncadd [#allocation6], 4294967200  ;;  %v69_v0 = vlaneseq  ;;  %v63_v1 = vld [vmem:[#allocation5] sm:$0x3]  ;;  %v62_v4 = vld [vmem:[#allocation2] sm:$0x3] }
   0xf   :  { %vm64_vm0 = vcmp.lt.s32.totalorder %v63_v1, 0  ;;  %v65_v2 = vadd.s32 5, %v63_v1  ;;  %vm98_vm1 = vcmask 1043456   ;;  %v409_v12 = vmov 0.0   ;;  %v93_v16 = vld [vmem:[%s470_s2] sm:$0x1] }
  0x10   :  { %v70_v3 = vshrl.u32 %v69_v0, 7  ;;  %v410_v15 = vmov 1.0   ;;  %vm94_vm7 = vcmask 162816   ;;  %v155_v17 = vld [vmem:[#allocation7] sm:$0xf]  ;;  %s411_s2 = smov [#allocation9]  }
  0x11   :  { %v66_v5 = vsel %vm64_vm0, %v65_v2, %v63_v1  ;;  %s221_s7 = sshll.u32 %s411_s2, 4  ;;  %s223_s10 = sshll.u32 %s473_s5, 4  ;;  %vm148_vm11 = vcmask 1040384   ;;  %vm152_vm12 = vcmp.lt.s32.totalorder %v69_v0, 256  ;;  %s222_s7 = int_to_ptr.vmem [resolvable:$true] %s221_s7  ;;  %s224_s10 = int_to_ptr.hbm [resolvable:$true] %s223_s10 }
  0x12   :  { %v67_v6 = vmul.u32 4, %v66_v5  ;;  %v72_v8 = vadd.s32 16, %v70_v3  ;;  %v71_v9 = vadd.s32 8, %v70_v3  ;;  %s412_s11 = smov [#allocation8]   ;;  %s212_s15 = sshll.u32 %s472_s4, 4  ;;  %s213_s15 = int_to_ptr.hbm [resolvable:$true] %s212_s15 }
  0x13   :  { %s210_s12 = sshll.u32 %s412_s11, 4  ;;  %s211_s12 = int_to_ptr.vmem [resolvable:$true] %s210_s12 }
  0x14   :  { %v68_v7 = vadd.s32 %v67_v6, %v62_v4 }
  0x16   :  { %v74_v10 = vperm.slane %v68_v7, 1  ;;  %v73_v11 = vperm.slane %v68_v7, 0 }
  0x18   :  { %vm80_vm2 = vcmp.eq.s32.totalorder %v72_v8, %v74_v10  ;;  %vm79_vm3 = vcmp.eq.s32.totalorder %v72_v8, %v73_v11  ;;  %vm78_vm4 = vcmp.eq.s32.totalorder %v71_v9, %v74_v10  ;;  %vm77_vm5 = vcmp.eq.s32.totalorder %v71_v9, %v73_v11 }
  0x19   :  { %v244_v13 = vsel %vm80_vm2, 1.0, %v409_v12  ;;  %v243_v14 = vsel %vm79_vm3, 1.0, %v409_v12  ;;  %vm76_vm6 = vcmp.eq.s32.totalorder %v70_v3, %v74_v10  ;;  %vm75_vm8 = vcmp.eq.s32.totalorder %v70_v3, %v73_v11 }
  0x1a   :  { %249 = vmatpush.msk.msra.mxu1 %vm98_vm1, %v244_v13  ;;  %257 = vmatpush.msk.msra.mxu3 %vm98_vm1, %v244_v13 }
  0x1b   :  { %245 = vmatpush.msk.msra.mxu0 %vm98_vm1, %v243_v14  ;;  %253 = vmatpush.msk.msra.mxu2 %vm98_vm1, %v243_v14 }
  0x1c   :  { %250 = vmatpush.msk.msra.mxu1 %vm78_vm4, %v410_v15  ;;  %258 = vmatpush.msk.msra.mxu3 %vm78_vm4, %v410_v15 }
  0x1d   :  { %246 = vmatpush.msk.msra.mxu0 %vm77_vm5, %v410_v15  ;;  %254 = vmatpush.msk.msra.mxu2 %vm77_vm5, %v410_v15 }
  0x1e   :  { %251 = vmatpush.msk.msra.mxu1 %vm76_vm6, %v410_v15  ;;  %259 = vmatpush.msk.msra.mxu3 %vm76_vm6, %v410_v15 }
  0x1f   :  { %252 = vmatmul.msk.f32.vlgmr.msra.gmra.mxu1 %vm94_vm7, %v93_v16  ;;  %260 = vmatmul.msk.f32.vlgmr.msra.gmra.mxu3 %vm94_vm7, %v155_v17 }
  0x20   :  { %247 = vmatpush.msk.msra.mxu0 %vm75_vm8, %v410_v15  ;;  %255 = vmatpush.msk.msra.mxu2 %vm75_vm8, %v410_v15 }
  0x21   :  { %248 = vmatmul.msk.f32.vlgmr.msra.gmra.mxu0 %vm94_vm7, %v93_v16  ;;  %256 = vmatmul.msk.f32.vlgmr.msra.gmra.mxu2 %vm94_vm7, %v155_v17 }
  0x9c   :  { %v142_v18 = vpop.f32.mrf.mxu1 }
  0x9d   :  { %vm266_vm9 = vcmp.lt.s32.totalorder %v142_v18, 0  ;;  %v267_v19 = vceil.f32 %v142_v18  ;;  %v268_v20 = vfloor.f32 %v142_v18 }
  0x9e   :  { %v122_v21 = vpop.f32.mrf.mxu0 }
  0x9f   :  { %v269_v22 = vsel %vm266_vm9, %v267_v19, %v268_v20  ;;  %vm261_vm10 = vcmp.lt.s32.totalorder %v122_v21, 0  ;;  %v262_v23 = vceil.f32 %v122_v21  ;;  %v263_v24 = vfloor.f32 %v122_v21 }
  0xa0   :  { %v270_v25 = vcvt.f32.s32 %v269_v22 }
  0xa1   :  { %v264_v26 = vsel %vm261_vm10, %v262_v23, %v263_v24 }
  0xa2   :  { %v147_v27 = vrot.slane %v270_v25, 7  ;;  %v265_v28 = vcvt.f32.s32 %v264_v26  ;;  %v196_v29 = vpop.f32.mrf.mxu3 }
  0xa3   :  { %v201_v30 = vrot.slane %v196_v29, 4 }
  0xa4   :  { %v176_v31 = vpop.f32.mrf.mxu2  ;;  %v149_v32 = vsel %vm148_vm11, %v265_v28, %v147_v27 }
  0xa5   :  { %v202_v33 = vsel %vm98_vm1, %v176_v31, %v201_v30  ;;  %154 = vst.msk [vmem:[#allocation9] sm:$0x3] %vm152_vm12, %v149_v32 }
  0xa6   :  { %204 = vst [vmem:[#allocation8] sm:$0xff] %v202_v33  ;;  %226 = dma.vmem_to_hbm [thread:$0]  %s222_s7, 32, %s224_s10, [#allocation10]  }
  0xa7   :  { %215 = dma.vmem_to_hbm [thread:$0]  %s211_s12, 128, %s213_s15, [#allocation4]  }
  0xa8   :  { %402 = dma.done.wait [#allocation4], 128  }
  0xa9   :  { %403 = vsyncadd [#allocation4], 4294967168 }
  0xaa   :  { %404 = dma.done.wait [#allocation10], 32  }
  0xab   :  { %405 = vsyncadd [#allocation10], 4294967264 }
  0xac   :  { %235 = vsyncpa [#allocation3], 1 }
  0xad   :  { %236 = vsyncpa [#allocation6], 1 }
  0xae   :  { %237 = vsyncpa [#allocation4], 1 }
  0xaf   :  { %238 = vsyncpa [#allocation10], 1 }

</bundles_post_ra>
